<compile_context>
chip_gen: v6e
topology: v6e:2x2x1
jax: 0.10.0
libtpu: 0.0.40
codegen_flags: <defaults>
</compile_context>

<pallas_src>
import functools

import jax
import jax.numpy as jnp
import numpy as np
from jax.experimental import pallas as pl
from jax.experimental.pallas import tpu as pltpu


def _decoder_layer_kernel(x_ref, xh_ref, w1_ref, b1_ref, taps_ref, w2_ref,
                          b2_ref, g_ref, beta_ref, o_ref, hext_ref, *,
                          kernel_size, batch, halo, halo_pad, eps):
    """One (row_tile, E) tile of the flattened (T*B, E) input.

    x_ref   : (row_tile, E)  streaming activations for this tile
    xh_ref  : (halo_pad, E)  overlapping x window just before the tile
                             (clamped to block 0 and unused at tile 0)
    hext_ref: (halo + row_tile - batch, C) bf16 scratch:
              rows [0:halo)  = h of the halo rows preceding the tile
              rows [halo: )  = h of this tile's rows re-read by taps k < K-1
    """
    i = pl.program_id(0)
    x_in = x_ref[...]
    tm = x_in.shape[0]

    # ---- linear1 on the MXU (bf16 operands, f32 accumulation) ----
    h = jnp.dot(x_in.astype(jnp.bfloat16), w1_ref[...],
                preferred_element_type=jnp.float32) + b1_ref[...]

    taps = taps_ref[...]                         # (K, C) f32, already softmaxed

    if kernel_size > 1:
        # Halo h: tile 0 -> causal zero padding; otherwise recompute from the
        # overlapping x window (removes the serial carry -> "parallel" grid).
        @pl.when(i == 0)
        def _():
            hext_ref[0:halo, :] = jnp.zeros((halo, hext_ref.shape[1]),
                                            hext_ref.dtype)

        @pl.when(i > 0)
        def _():
            h_halo = jnp.dot(xh_ref[halo_pad - halo:, :].astype(jnp.bfloat16),
                             w1_ref[...],
                             preferred_element_type=jnp.float32) + b1_ref[...]
            hext_ref[0:halo, :] = h_halo.astype(hext_ref.dtype)

        # Store only the h rows re-read by taps k < K-1 (rows [0, tm-batch)).
        if tm > batch:
            hext_ref[halo:, :] = h[:tm - batch, :].astype(hext_ref.dtype)

        # out[r, c] = sum_k taps[k, c] * h_global[r - (K-1-k)*B, c]
        #           = taps[K-1, c]*h[r, c] + sum_{k<K-1} taps[k, c]*hext[k*B+r, c]
        acc = taps[kernel_size - 1:kernel_size, :] * h     # live f32 h, last tap
        for k in range(kernel_size - 1):
            # bf16 scratch * f32 taps promotes to f32 accumulation.
            acc = acc + taps[k:k + 1, :] * hext_ref[k * batch:k * batch + tm, :]
    else:
        acc = taps[0:1, :] * h

    # ---- linear2 on the MXU ----
    y = jnp.dot(acc.astype(jnp.bfloat16), w2_ref[...],
                preferred_element_type=jnp.float32) + b2_ref[...]

    # ---- residual + post LayerNorm (f32); var = E[z^2] - E[z]^2 keeps the two
    #      cross-lane reductions independent ----
    z = x_in.astype(jnp.float32) + y
    m1 = jnp.mean(z, axis=-1, keepdims=True)
    m2 = jnp.mean(z * z, axis=-1, keepdims=True)
    zn = (z - m1) * jax.lax.rsqrt(m2 - m1 * m1 + eps)
    o_ref[...] = (zn * g_ref[...] + beta_ref[...]).astype(o_ref.dtype)


def _vmem_limit_bytes():
    # Generation-aware VMEM cap: ~3/4 of physical (96 MiB on v5e/v6e's 128 MiB,
    # 48 MiB on v7x's 64 MiB).  Falls back to a v7x-safe 48 MiB.
    try:
        cap = int(pltpu.get_tpu_info().vmem_capacity_bytes)
    except Exception:
        cap = 64 * 1024 * 1024
    return (cap * 3) // 4


def light_conv_decoder_layer(x_tbe, params, *, num_heads, kernel_size,
                             eps=1e-5, row_tile=None):
    """x_tbe: (T, B, E) fairseq TBC layout (f32 or bf16).  Returns (T, B, E)
    in x_tbe.dtype.  Inference path (dropouts are no-ops), post-LayerNorm."""
    T, B, E = x_tbe.shape
    W1, b1, conv_w, W2, b2, gamma, beta = (
        params["W1"], params["b1"], params["conv_w"],
        params["W2"], params["b2"], params["gamma"], params["beta"])
    C = W1.shape[1]
    R = C // num_heads

    # Hoisted per-head softmax over kernel taps, expanded to (K, C):
    # channel c belongs to head c // R.
    w_sm = jax.nn.softmax(conv_w.reshape(num_heads, kernel_size), axis=-1)
    taps = jnp.repeat(w_sm, R, axis=0).T.astype(jnp.float32)     # (K, C)

    # Flatten (T, B, E) -> (T*B, E): free (contiguous reshape, no transpose).
    M = T * B
    x2d = x_tbe.reshape(M, E)

    halo = (kernel_size - 1) * B if kernel_size > 1 else 0
    halo_pad = max(8, -(-halo // 8) * 8)          # sublane-aligned halo window

    if row_tile is None:
        # Largest multiple of halo_pad that divides M, capped at 512 rows.
        cap = min(M, 512)
        row_tile = M
        for cand in range(cap - cap % halo_pad, 0, -halo_pad):
            if cand > 0 and M % cand == 0:
                row_tile = cand
                break
    n_tiles = M // row_tile
    assert M % row_tile == 0, "row_tile must divide T*B"
    assert row_tile % 8 == 0, "row_tile must be a multiple of 8 (sublane)"
    if kernel_size > 1 and n_tiles > 1:
        assert row_tile % halo_pad == 0, (
            f"row_tile must be a multiple of the padded halo ({halo_pad})")
    steps = max(row_tile // halo_pad, 1)

    # Scratch rows = halo + (rows of h re-read by taps k < K-1).
    scratch_rows = max(halo, halo + row_tile - B) if kernel_size > 1 else 8

    kern = functools.partial(_decoder_layer_kernel, kernel_size=kernel_size,
                             batch=B, halo=halo, halo_pad=halo_pad, eps=eps)

    resident = dict(pipeline_mode=pl.Buffered(1))   # single-buffer weights

    out2d = pl.pallas_call(
        kern,
        out_shape=jax.ShapeDtypeStruct((M, E), x_tbe.dtype),
        grid_spec=pltpu.PrefetchScalarGridSpec(
            num_scalar_prefetch=0,
            grid=(n_tiles,),
            in_specs=[
                # streaming activations for this tile
                pl.BlockSpec((row_tile, E), lambda i: (i, 0)),
                # overlapping halo window: halo_pad rows just before the tile
                # (clamped to block 0 at i == 0, where it is unused)
                pl.BlockSpec((halo_pad, E),
                             lambda i: (jnp.maximum(i * steps - 1, 0), 0)),
                pl.BlockSpec((E, C), lambda i: (0, 0), **resident),   # W1 bf16
                pl.BlockSpec((1, C), lambda i: (0, 0), **resident),   # b1
                pl.BlockSpec((kernel_size, C), lambda i: (0, 0), **resident),
                pl.BlockSpec((C, E), lambda i: (0, 0), **resident),   # W2 bf16
                pl.BlockSpec((1, E), lambda i: (0, 0), **resident),   # b2
                pl.BlockSpec((1, E), lambda i: (0, 0), **resident),   # gamma
                pl.BlockSpec((1, E), lambda i: (0, 0), **resident),   # beta
            ],
            out_specs=pl.BlockSpec((row_tile, E), lambda i: (i, 0)),
            scratch_shapes=[pltpu.VMEM((scratch_rows, C), jnp.bfloat16)],
        ),
        compiler_params=pltpu.CompilerParams(
            dimension_semantics=("parallel",),   # no carried state across tiles
            vmem_limit_bytes=_vmem_limit_bytes()),
    )(x2d, x2d, W1.astype(jnp.bfloat16), b1.reshape(1, C), taps,
      W2.astype(jnp.bfloat16), b2.reshape(1, E), gamma.reshape(1, E),
      beta.reshape(1, E))

    return out2d.reshape(T, B, E)


# ----------------------------- pure-JAX reference -----------------------------
def _reference(x_tbe, params, num_heads, kernel_size, eps=1e-5):
    W1, b1, conv_w, W2, b2, gamma, beta = (
        params["W1"], params["b1"], params["conv_w"],
        params["W2"], params["b2"], params["gamma"], params["beta"])
    T, B, E = x_tbe.shape
    C = W1.shape[1]
    R = C // num_heads
    residual = x_tbe
    h = x_tbe @ W1 + b1                                   # (T, B, C)
    w = jax.nn.softmax(conv_w.reshape(num_heads, kernel_size), axis=-1)
    wexp = jnp.repeat(w, R, axis=0)                       # (C, K)
    h_pad = jnp.pad(h, ((kernel_size - 1, 0), (0, 0), (0, 0)))
    conv = jnp.zeros_like(h)
    for k in range(kernel_size):
        conv = conv + h_pad[k:k + T] * wexp[None, None, :, k].reshape(1, 1, C)
    y = conv @ W2 + b2                                    # (T, B, E)
    z = residual + y
    mean = jnp.mean(z, axis=-1, keepdims=True)
    var = jnp.mean((z - mean) ** 2, axis=-1, keepdims=True)
    return ((z - mean) * jax.lax.rsqrt(var + eps)) * gamma + beta


# ----------------------------------- main -----------------------------------
def _xavier_uniform(key, fan_in, fan_out):
    bound = float(np.sqrt(6.0 / (fan_in + fan_out)))
    return jax.random.uniform(key, (fan_in, fan_out), jnp.float32, -bound, bound)


if __name__ == "__main__":
    T, B = 16, 8                # seq, batch (B % 8 == 0 -> sublane-aligned taps)
    E, C = 128, 128             # embed_dim, conv_dim (lane-dense)
    H, K = 4, 3                 # num_heads, kernel_size

    key = jax.random.PRNGKey(0)
    k_x, k_w1, k_w2, k_cv = jax.random.split(key, 4)

    params = {
        "W1": _xavier_uniform(k_w1, E, C),                       # linear1 (E -> C)
        "b1": jnp.zeros((C,), jnp.float32),
        "conv_w": jax.random.uniform(k_cv, (H, 1, K), jnp.float32, -0.5, 0.5),
        "W2": _xavier_uniform(k_w2, C, E),                       # linear2 (C -> E)
        "b2": jnp.zeros((E,), jnp.float32),
        "gamma": jnp.ones((E,), jnp.float32),                    # LayerNorm weight
        "beta": jnp.zeros((E,), jnp.float32),                    # LayerNorm bias
    }

    # Stream activations in bf16 (halves x/out HBM bytes); residual + LayerNorm
    # math stays f32 inside the kernel.
    x = jax.random.normal(k_x, (T, B, E), jnp.float32).astype(jnp.bfloat16)

    # row_tile=32 over M = T*B = 128 rows -> 4 tiles; halo = (K-1)*B = 16 rows,
    # halo_pad = 16 -> exercises the parallel overlapping-halo path.
    out = light_conv_decoder_layer(x, params, num_heads=H, kernel_size=K,
                                   row_tile=32)
    out = jax.block_until_ready(out)

    ref = _reference(x.astype(jnp.float32), params, H, K)
    # bf16 streaming + bf16 MXU operands with f32 accumulation -> loose tolerance.
    np.testing.assert_allclose(np.asarray(out.astype(jnp.float32)),
                               np.asarray(ref), rtol=5e-2, atol=5e-2)
    print("KERNEL_OK")
</pallas_src>

<mosaic_0001>
module attributes {stable_mosaic.version = 11 : i64} {
  func.func @_decoder_layer_kernel(%arg0: i32, %arg1: memref<32x128xbf16, #tpu.memory_space<vmem>>, %arg2: memref<16x128xbf16, #tpu.memory_space<vmem>>, %arg3: memref<128x128xbf16, #tpu.memory_space<vmem>>, %arg4: memref<1x128xf32, #tpu.memory_space<vmem>>, %arg5: memref<3x128xf32, #tpu.memory_space<vmem>>, %arg6: memref<128x128xbf16, #tpu.memory_space<vmem>>, %arg7: memref<1x128xf32, #tpu.memory_space<vmem>>, %arg8: memref<1x128xf32, #tpu.memory_space<vmem>>, %arg9: memref<1x128xf32, #tpu.memory_space<vmem>>, %arg10: memref<32x128xbf16, #tpu.memory_space<vmem>>, %arg11: memref<40x128xbf16, #tpu.memory_space<vmem>>) attributes {dimension_semantics = [#tpu.dimension_semantics<parallel>], iteration_bounds = array<i64: 4>, scalar_prefetch = 0 : i64, scratch_operands = 1 : i64, tpu.core_type = #tpu.core_type<tc>, window_params = [{transform_indices = @transform_0, window_bounds = array<i64: 32, 128>}, {transform_indices = @transform_1, window_bounds = array<i64: 16, 128>}, {pipeline_mode = #tpu.pipeline_mode<synchronous>, transform_indices = @transform_2, window_bounds = array<i64: 128, 128>}, {pipeline_mode = #tpu.pipeline_mode<synchronous>, transform_indices = @transform_3, window_bounds = array<i64: 1, 128>}, {pipeline_mode = #tpu.pipeline_mode<synchronous>, transform_indices = @transform_4, window_bounds = array<i64: 3, 128>}, {pipeline_mode = #tpu.pipeline_mode<synchronous>, transform_indices = @transform_5, window_bounds = array<i64: 128, 128>}, {pipeline_mode = #tpu.pipeline_mode<synchronous>, transform_indices = @transform_6, window_bounds = array<i64: 1, 128>}, {pipeline_mode = #tpu.pipeline_mode<synchronous>, transform_indices = @transform_7, window_bounds = array<i64: 1, 128>}, {pipeline_mode = #tpu.pipeline_mode<synchronous>, transform_indices = @transform_8, window_bounds = array<i64: 1, 128>}, {transform_indices = @transform_9, window_bounds = array<i64: 32, 128>}]} {
    %c0 = arith.constant 0 : index
    %c0_0 = arith.constant 0 : index
    %0 = vector.load %arg1[%c0, %c0_0] : memref<32x128xbf16, #tpu.memory_space<vmem>>, vector<32x128xbf16>
    %c0_1 = arith.constant 0 : index
    %c0_2 = arith.constant 0 : index
    %1 = vector.load %arg3[%c0_1, %c0_2] : memref<128x128xbf16, #tpu.memory_space<vmem>>, vector<128x128xbf16>
    %cst = arith.constant dense<0.000000e+00> : vector<32x128xf32>
    %2 = tpu.matmul %0, %1, %cst {dimension_numbers = #tpu.dot_dimension_numbers<[1], [0], [0], [1], [0, 0, 1, 1], [], []>} : vector<32x128xbf16>, vector<128x128xbf16>, vector<32x128xf32> -> vector<32x128xf32>
    %c0_3 = arith.constant 0 : index
    %c0_4 = arith.constant 0 : index
    %3 = vector.load %arg4[%c0_3, %c0_4] : memref<1x128xf32, #tpu.memory_space<vmem>>, vector<1x128xf32>
    %4 = vector.broadcast %3 : vector<1x128xf32> to vector<32x128xf32>
    %5 = arith.addf %2, %4 : vector<32x128xf32>
    %c0_5 = arith.constant 0 : index
    %c0_6 = arith.constant 0 : index
    %6 = vector.load %arg5[%c0_5, %c0_6] : memref<3x128xf32, #tpu.memory_space<vmem>>, vector<3x128xf32>
    %c0_i32 = arith.constant 0 : i32
    %7 = arith.cmpi eq, %arg0, %c0_i32 : i32
    %8 = arith.extui %7 : i1 to i32
    %c0_i32_7 = arith.constant 0 : i32
    %9 = arith.cmpi ne, %8, %c0_i32_7 : i32
    scf.if %9 {
      %cst_30 = arith.constant 0.000000e+00 : bf16
      %65 = vector.broadcast %cst_30 : bf16 to vector<16x128xbf16>
      %c0_31 = arith.constant 0 : index
      %c0_32 = arith.constant 0 : index
      %66 = vector.load %arg11[%c0_31, %c0_32] : memref<40x128xbf16, #tpu.memory_space<vmem>>, vector<16x128xbf16>
      tpu.vector_store %arg11[%c0_31, %c0_32], %65 {strides = array<i32>} : memref<40x128xbf16, #tpu.memory_space<vmem>>, vector<16x128xbf16>,
    } else {
    }
    %c0_i32_8 = arith.constant 0 : i32
    %10 = arith.cmpi sgt, %arg0, %c0_i32_8 : i32
    %11 = arith.extui %10 : i1 to i32
    %c0_i32_9 = arith.constant 0 : i32
    %12 = arith.cmpi ne, %11, %c0_i32_9 : i32
    scf.if %12 {
      %c0_30 = arith.constant 0 : index
      %c0_31 = arith.constant 0 : index
      %65 = vector.load %arg2[%c0_30, %c0_31] : memref<16x128xbf16, #tpu.memory_space<vmem>>, vector<16x128xbf16>
      %c0_32 = arith.constant 0 : index
      %c0_33 = arith.constant 0 : index
      %66 = vector.load %arg3[%c0_32, %c0_33] : memref<128x128xbf16, #tpu.memory_space<vmem>>, vector<128x128xbf16>
      %cst_34 = arith.constant dense<0.000000e+00> : vector<16x128xf32>
      %67 = tpu.matmul %65, %66, %cst_34 {dimension_numbers = #tpu.dot_dimension_numbers<[1], [0], [0], [1], [0, 0, 1, 1], [], []>} : vector<16x128xbf16>, vector<128x128xbf16>, vector<16x128xf32> -> vector<16x128xf32>
      %c0_35 = arith.constant 0 : index
      %c0_36 = arith.constant 0 : index
      %68 = vector.load %arg4[%c0_35, %c0_36] : memref<1x128xf32, #tpu.memory_space<vmem>>, vector<1x128xf32>
      %69 = vector.broadcast %68 : vector<1x128xf32> to vector<16x128xf32>
      %70 = arith.addf %67, %69 : vector<16x128xf32>
      %71 = arith.truncf %70 : vector<16x128xf32> to vector<16x128xbf16>
      %c0_37 = arith.constant 0 : index
      %c0_38 = arith.constant 0 : index
      %72 = vector.load %arg11[%c0_37, %c0_38] : memref<40x128xbf16, #tpu.memory_space<vmem>>, vector<16x128xbf16>
      tpu.vector_store %arg11[%c0_37, %c0_38], %71 {strides = array<i32>} : memref<40x128xbf16, #tpu.memory_space<vmem>>, vector<16x128xbf16>,
    } else {
    }
    %13 = vector.extract_strided_slice %5 {offsets = [0, 0], sizes = [24, 128], strides = [1, 1]} : vector<32x128xf32> to vector<24x128xf32>
    %14 = arith.truncf %13 : vector<24x128xf32> to vector<24x128xbf16>
    %c16 = arith.constant 16 : index
    %c0_10 = arith.constant 0 : index
    %15 = vector.load %arg11[%c16, %c0_10] : memref<40x128xbf16, #tpu.memory_space<vmem>>, vector<24x128xbf16>
    tpu.vector_store %arg11[%c16, %c0_10], %14 {strides = array<i32>} : memref<40x128xbf16, #tpu.memory_space<vmem>>, vector<24x128xbf16>,
    %16 = vector.extract_strided_slice %6 {offsets = [2, 0], sizes = [1, 128], strides = [1, 1]} : vector<3x128xf32> to vector<1x128xf32>
    %17 = vector.broadcast %16 : vector<1x128xf32> to vector<32x128xf32>
    %18 = arith.mulf %17, %5 : vector<32x128xf32>
    %19 = vector.extract_strided_slice %6 {offsets = [0, 0], sizes = [1, 128], strides = [1, 1]} : vector<3x128xf32> to vector<1x128xf32>
    %c0_11 = arith.constant 0 : index
    %c0_12 = arith.constant 0 : index
    %20 = vector.load %arg11[%c0_11, %c0_12] : memref<40x128xbf16, #tpu.memory_space<vmem>>, vector<32x128xbf16>
    %21 = arith.extf %20 : vector<32x128xbf16> to vector<32x128xf32>
    %22 = vector.broadcast %19 : vector<1x128xf32> to vector<32x128xf32>
    %23 = arith.mulf %22, %21 : vector<32x128xf32>
    %24 = arith.addf %18, %23 : vector<32x128xf32>
    %25 = vector.extract_strided_slice %6 {offsets = [1, 0], sizes = [1, 128], strides = [1, 1]} : vector<3x128xf32> to vector<1x128xf32>
    %c8 = arith.constant 8 : index
    %c0_13 = arith.constant 0 : index
    %26 = vector.load %arg11[%c8, %c0_13] : memref<40x128xbf16, #tpu.memory_space<vmem>>, vector<32x128xbf16>
    %27 = arith.extf %26 : vector<32x128xbf16> to vector<32x128xf32>
    %28 = vector.broadcast %25 : vector<1x128xf32> to vector<32x128xf32>
    %29 = arith.mulf %28, %27 : vector<32x128xf32>
    %30 = arith.addf %24, %29 : vector<32x128xf32>
    %31 = arith.truncf %30 : vector<32x128xf32> to vector<32x128xbf16>
    %c0_14 = arith.constant 0 : index
    %c0_15 = arith.constant 0 : index
    %32 = vector.load %arg6[%c0_14, %c0_15] : memref<128x128xbf16, #tpu.memory_space<vmem>>, vector<128x128xbf16>
    %cst_16 = arith.constant dense<0.000000e+00> : vector<32x128xf32>
    %33 = tpu.matmul %31, %32, %cst_16 {dimension_numbers = #tpu.dot_dimension_numbers<[1], [0], [0], [1], [0, 0, 1, 1], [], []>} : vector<32x128xbf16>, vector<128x128xbf16>, vector<32x128xf32> -> vector<32x128xf32>
    %c0_17 = arith.constant 0 : index
    %c0_18 = arith.constant 0 : index
    %34 = vector.load %arg7[%c0_17, %c0_18] : memref<1x128xf32, #tpu.memory_space<vmem>>, vector<1x128xf32>
    %35 = vector.broadcast %34 : vector<1x128xf32> to vector<32x128xf32>
    %36 = arith.addf %33, %35 : vector<32x128xf32>
    %37 = arith.extf %0 : vector<32x128xbf16> to vector<32x128xf32>
    %38 = arith.addf %37, %36 : vector<32x128xf32>
    %cst_19 = arith.constant dense<0.000000e+00> : vector<32xf32>
    %39 = vector.multi_reduction <add>, %38, %cst_19 [1] : vector<32x128xf32> to vector<32xf32>
    %40 = vector.shape_cast %39 : vector<32xf32> to vector<32x1xf32>
    %cst_20 = arith.constant 1.280000e+02 : f32
    %41 = vector.broadcast %cst_20 : f32 to vector<32x1xf32>
    %42 = arith.divf %40, %41 : vector<32x1xf32>
    %43 = arith.mulf %38, %38 : vector<32x128xf32>
    %cst_21 = arith.constant dense<0.000000e+00> : vector<32xf32>
    %44 = vector.multi_reduction <add>, %43, %cst_21 [1] : vector<32x128xf32> to vector<32xf32>
    %45 = vector.shape_cast %44 : vector<32xf32> to vector<32x1xf32>
    %cst_22 = arith.constant 1.280000e+02 : f32
    %46 = vector.broadcast %cst_22 : f32 to vector<32x1xf32>
    %47 = arith.divf %45, %46 : vector<32x1xf32>
    %48 = vector.broadcast %42 : vector<32x1xf32> to vector<32x128xf32>
    %49 = arith.subf %38, %48 : vector<32x128xf32>
    %50 = arith.mulf %42, %42 : vector<32x1xf32>
    %51 = arith.subf %47, %50 : vector<32x1xf32>
    %cst_23 = arith.constant 9.99999974E-6 : f32
    %52 = vector.broadcast %cst_23 : f32 to vector<32x1xf32>
    %53 = arith.addf %51, %52 : vector<32x1xf32>
    %54 = math.rsqrt %53 : vector<32x1xf32>
    %55 = vector.broadcast %54 : vector<32x1xf32> to vector<32x128xf32>
    %56 = arith.mulf %49, %55 : vector<32x128xf32>
    %c0_24 = arith.constant 0 : index
    %c0_25 = arith.constant 0 : index
    %57 = vector.load %arg8[%c0_24, %c0_25] : memref<1x128xf32, #tpu.memory_space<vmem>>, vector<1x128xf32>
    %58 = vector.broadcast %57 : vector<1x128xf32> to vector<32x128xf32>
    %59 = arith.mulf %56, %58 : vector<32x128xf32>
    %c0_26 = arith.constant 0 : index
    %c0_27 = arith.constant 0 : index
    %60 = vector.load %arg9[%c0_26, %c0_27] : memref<1x128xf32, #tpu.memory_space<vmem>>, vector<1x128xf32>
    %61 = vector.broadcast %60 : vector<1x128xf32> to vector<32x128xf32>
    %62 = arith.addf %59, %61 : vector<32x128xf32>
    %63 = arith.truncf %62 : vector<32x128xf32> to vector<32x128xbf16>
    %c0_28 = arith.constant 0 : index
    %c0_29 = arith.constant 0 : index
    %64 = vector.load %arg10[%c0_28, %c0_29] : memref<32x128xbf16, #tpu.memory_space<vmem>>, vector<32x128xbf16>
    tpu.vector_store %arg10[%c0_28, %c0_29], %63 {strides = array<i32>} : memref<32x128xbf16, #tpu.memory_space<vmem>>, vector<32x128xbf16>,
    return
  }
  func.func @transform_0(%arg0: i32) -> (i32, i32) {
    %c0_i32 = arith.constant 0 : i32
    %c0_i32_0 = arith.constant 0 : i32
    return %arg0, %c0_i32 : i32, i32
  }
  func.func @transform_1(%arg0: i32) -> (i32, i32) {
    %c2_i32 = arith.constant 2 : i32
    %0 = arith.muli %arg0, %c2_i32 : i32
    %c1_i32 = arith.constant 1 : i32
    %1 = arith.subi %0, %c1_i32 : i32
    %c0_i32 = arith.constant 0 : i32
    %2 = arith.maxsi %1, %c0_i32 : i32
    %c0_i32_0 = arith.constant 0 : i32
    %c0_i32_1 = arith.constant 0 : i32
    return %2, %c0_i32_0 : i32, i32
  }
  func.func @transform_2(%arg0: i32) -> (i32, i32) {
    %c0_i32 = arith.constant 0 : i32
    %c0_i32_0 = arith.constant 0 : i32
    %c0_i32_1 = arith.constant 0 : i32
    return %c0_i32, %c0_i32_0 : i32, i32
  }
  func.func @transform_3(%arg0: i32) -> (i32, i32) {
    %c0_i32 = arith.constant 0 : i32
    %c0_i32_0 = arith.constant 0 : i32
    %c0_i32_1 = arith.constant 0 : i32
    return %c0_i32, %c0_i32_0 : i32, i32
  }
  func.func @transform_4(%arg0: i32) -> (i32, i32) {
    %c0_i32 = arith.constant 0 : i32
    %c0_i32_0 = arith.constant 0 : i32
    %c0_i32_1 = arith.constant 0 : i32
    return %c0_i32, %c0_i32_0 : i32, i32
  }
  func.func @transform_5(%arg0: i32) -> (i32, i32) {
    %c0_i32 = arith.constant 0 : i32
    %c0_i32_0 = arith.constant 0 : i32
    %c0_i32_1 = arith.constant 0 : i32
    return %c0_i32, %c0_i32_0 : i32, i32
  }
  func.func @transform_6(%arg0: i32) -> (i32, i32) {
    %c0_i32 = arith.constant 0 : i32
    %c0_i32_0 = arith.constant 0 : i32
    %c0_i32_1 = arith.constant 0 : i32
    return %c0_i32, %c0_i32_0 : i32, i32
  }
  func.func @transform_7(%arg0: i32) -> (i32, i32) {
    %c0_i32 = arith.constant 0 : i32
    %c0_i32_0 = arith.constant 0 : i32
    %c0_i32_1 = arith.constant 0 : i32
    return %c0_i32, %c0_i32_0 : i32, i32
  }
  func.func @transform_8(%arg0: i32) -> (i32, i32) {
    %c0_i32 = arith.constant 0 : i32
    %c0_i32_0 = arith.constant 0 : i32
    %c0_i32_1 = arith.constant 0 : i32
    return %c0_i32, %c0_i32_0 : i32, i32
  }
  func.func @transform_9(%arg0: i32) -> (i32, i32) {
    %c0_i32 = arith.constant 0 : i32
    %c0_i32_0 = arith.constant 0 : i32
    return %arg0, %c0_i32 : i32, i32
  }
}

</mosaic_0001>

<bundles_post_ra>
// kernel: tpu_custom_call.1
= control target key start
LH: loop header
LB: loop body
LE: loop exit
PB: predicated region body
PF: predicated region fallthrough
CT: control target
= control target key end

     0   :  { %s2124_s0 = inlined_call_operand.hbm [shape: bf16[128,128], index: 0, kind: input, shape index: {}]   ;;  %s2125_s1 = inlined_call_operand.hbm [shape: bf16[128,128], index: 1, kind: input, shape index: {}]   ;;  %s2126_s2 = inlined_call_operand.hbm [shape: bf16[128,128], index: 2, kind: input, shape index: {}]   ;;  %s2127_s3 = inlined_call_operand.vmem [shape: f32[1,128], index: 3, kind: input, shape index: {}]   ;;  %s2128_s4 = inlined_call_operand.vmem [shape: f32[3,128], index: 4, kind: input, shape index: {}]   ;;  %s2129_s5 = inlined_call_operand.hbm [shape: bf16[128,128], index: 5, kind: input, shape index: {}]   ;;  %s2130_s6 = inlined_call_operand.vmem [shape: f32[1,128], index: 6, kind: input, shape index: {}]   ;;  %s2131_s7 = inlined_call_operand.vmem [shape: f32[1,128], index: 7, kind: input, shape index: {}]   ;;  %s2132_s8 = inlined_call_operand.vmem [shape: f32[1,128], index: 8, kind: input, shape index: {}]   ;;  %s2133_s9 = inlined_call_operand.hbm [shape: bf16[128,128], index: 9, kind: output, shape index: {}]  }
   0x1   :  { %2150 = sst [smem:[#allocation23_spill]] %s2124_s0 }
   0x2   :  { %2151 = sst [smem:[#allocation24_spill]] %s2126_s2 }
   0x3   :  { %2152 = sst [smem:[#allocation25_spill]] %s2129_s5 }
   0x4   :  { %14 = vsyncpa [#allocation4], 0 }
   0x5   :  { %16 = vsyncpa [#allocation4 + $0x1], 0 }
   0x6   :  { %17 = vsyncpa [#allocation7], 0 }
   0x7   :  { %19 = vsyncpa [#allocation7 + $0x1], 0 }
   0x8   :  { %20 = vsyncpa [#allocation10], 0 }
   0x9   :  { %21 = vsyncpa [#allocation5], 0 }
   0xa   :  { %23 = vsyncpa [#allocation5 + $0x1], 0  ;;  %s1757_s30 = smov 0   ;;  %s1759_s10 = smov 0  }
   0xb   :  { %s1761_s11 = smov 0   ;;  %s1763_s12 = smov 0  }
   0xc   :  { %s1765_s13 = smov 0   ;;  %s1767_s14 = smov 0  }
   0xd   :  { %s1769_s15 = smov 0  }
   0xe LB: > { %2153 = sst [smem:[#allocation17_spill]] %s1681_s12  ;;  %s1791_s16 = sadd.s32 4294967295, %s1693_s15   ;;  %s1693_s15 = sphi %s1769_s15, %s2189_s15   ;;  %s1689_s14 = sphi %s1767_s14, %s2192_s14   ;;  %s1685_s13 = sphi %s1765_s13, %s2197_s13   ;;  %s1681_s12 = sphi %s1763_s12, %s2196_s12   ;;  %s1677_s11 = sphi %s1761_s11, %s2195_s11   ;;  %s1673_s10 = sphi %s1759_s10, %s2194_s10   ;;  %s1669_s30 = sphi %s1757_s30, %s2193_s30  }
   0xf   : > { %2154 = sst [smem:[#allocation18_spill]] %s1689_s14  ;;  %s1135_s17 = sadd.s32 4294967294, %s1693_s15  }
  0x10   : > { %p49_p0 = scmp.ne.s32.totalorder %s1685_s13, %s1681_s12  ;;  %p2141_p1 = scmp.eq.s32.totalorder %s1791_s16, 0 }
  0x11   : > { %p83_p2 = scmp.ne.s32.totalorder %s1673_s10, %s1669_s30  ;;  %p260_p5 = scmp.eq.s32.totalorder %s1135_s17, 3 }
  0x12   : > { %p1801_p4 = por %p2141_p1, %p49_p0  ;;  %p1140_p7 = scmp.ge.s32.totalorder %s1693_s15, 1 }
  0x13   : > { %p1807_p6 = por %p83_p2, %p2141_p1  ;;  %p1812_p8 = por %p260_p5, %p49_p0 }
  0x14   : > { %s2155_s18 = scalar_select %p1801_p4, 1, 0 }
  0x15   : > { %s2156_s19 = scalar_select %p1807_p6, 1, 0 }
  0x16   : > { %s2157_s20 = scalar_select %p1812_p8, 1, 0 }
  0x17   : > { %p267_p9 = scmp.lt.s32.totalorder %s1693_s15, 5  ;;  %s1695_s22 = smov [#allocation8]  }
  0x18   : > { %2158 = sst [smem:[#allocation19_spill]] %s2157_s20  ;;  %s279_s23 = sshll.u32 %s1695_s22, 4  ;;  %s280_s23 = int_to_ptr.vmem [resolvable:$true] %s279_s23 }
  0x19   : > { %p1818_p11 = pnand %p1140_p7, %p267_p9  ;;  %s1696_s25 = smov [#allocation9]  }
  0x1a   : > { %s298_s26 = sshll.u32 %s1696_s25, 4  ;;  %s1496_s27 = scalar_lea.vmem %s280_s23, 1024  ;;  %s299_s26 = int_to_ptr.vmem [resolvable:$true] %s298_s26 }
  0x1b   : > { %s2159_s21 = scalar_select %p1818_p11, 1, 0 }
  0x1c   : > { %p1359_p12 = pneg %p1818_p11  ;;  %p1497_p2 = scmp.ne.s32.totalorder %s280_s23, %s1496_s27 }
  0x1d   : > { %p1504_p9 = scmp.lt.s32.totalorder %s280_s23, %s280_s23  ;;  %p1505_p10 = scmp.lt.s32.totalorder %s1496_s27, %s1496_s27 }
  0x1e   : > { %p1826_p13 = pnand %p1359_p12, %p2141_p1 }
  0x1f   : > { %p1506_p3 = por %p1505_p10, %p1504_p9 }
  0x20   : > { %p1487_p0 = pneg %p1826_p13 }
  0x22   : > { %p1499_p5 = pnand %p1497_p2, %p1487_p0 }
  0x24   : > { %p1500_p7 = pneg %p1499_p5 }
  0x26   : > { %p1507_p12 = pnand %p1506_p3, %p1500_p7 }
  0x28   : > { %1510 = shalt.err (!%p1507_p12)
}
  0x29   : > { %s2134_s28 = smov 64   ;;  %s2136_s29 = smov 4  }
  0x2a   : > { %s2161_s2 = sld [smem:[#allocation24_spill]]  ;;  %s1522_s22 = scalar_lea.vmem %s299_s26, 1024 }
  0x2b   : > { %p1523_p2 = scmp.ne.s32.totalorder %s299_s26, %s1522_s22  ;;  %p1530_p3 = scmp.lt.s32.totalorder %s299_s26, %s299_s26 }
  0x2c   : > { %p1531_p7 = scmp.lt.s32.totalorder %s1522_s22, %s1522_s22 }
  0x2d   : > { %p1525_p5 = pnand %p1523_p2, %p1487_p0 }
  0x2e   : > { %p1532_p9 = por %p1531_p7, %p1530_p3 }
  0x2f   : > { %p1526_p10 = pneg %p1525_p5 }
  0x30   : > { %1362 = dma.hbm_to_vmem [thread:$0]  (!%p1826_p13), %s2161_s2, 1024, %s280_s23, [#allocation7], %s2134_s28, %s2134_s28, %s2136_s29  }
  0x31   : > { %p1533_p12 = pnand %p1532_p9, %p1526_p10 }
  0x33   : > { %1536 = shalt.err (!%p1533_p12)
}
  0x34   : > { %s2162_s5 = sld [smem:[#allocation25_spill]]  ;;  %s1855_s23 = sadd.s32 1, %s1693_s15  }
  0x35   : > { %2163 = sst [smem:[#allocation20_spill]] %s1855_s23  ;;  %s36_s24 = sadd.s32 1, %s1689_s14 }
  0x36   : > { %s33_s30 = ssub.s32 %s1693_s15, %s1855_s23  ;;  %p43_p0 = scmp.ne.s32.totalorder %s1689_s14, %s1685_s13 }
  0x37   : > { %p34_p2 = scmp.eq.s32.totalorder %s33_s30, 0  ;;  %p2143_p5 = scmp.eq.s32.totalorder %s1693_s15, 0 }
  0x38   : > { %p2164_p10 = scmp.eq.s32.totalorder %s1791_s16, 3  ;;  %p2142_p7 = scmp.lt.s32.totalorder %s1693_s15, 4 }
  0x39   : > { %s1871_s22 = scalar_select %p34_p2, %s1689_s14, %s36_s24  }
  0x3a   : > { %1365 = dma.hbm_to_vmem [thread:$0]  (!%p1826_p13), %s2162_s5, 1024, %s299_s26, [#allocation10], %s2134_s28, %s2134_s28, %s2136_s29  }
  0x3b   : > { %p1865_p3 = por %p2164_p10, %p43_p0  ;;  %2166 = sst [smem:[#allocation21_spill]] %s1871_s22 }
  0x3c   : > { %p45_p13 = por %p2143_p5, %p43_p0  ;;  %s321_s26 = sand.u32 1, %s1689_s14  }
  0x3d   : > { %s2165_s17 = scalar_select %p1865_p3, 1, 0 }
  0x3e   : > { %s1144_s25 = sshll.u32 %s321_s26, 4  ;;  %s1208_s27 = sshll.u32 %s1693_s15, 8 }
  0x3f   : > { %s2167_s0 = sld [smem:[#allocation23_spill]]  ;;  %s325_s30 = scalar_lea.vmem [#allocation3], %s1144_s25 }
  0x40   : > { %s332_s5 = sshll.u32 %s325_s30, 4  ;;  %p1886_p9 = pnand %p2142_p7, %p45_p13  ;;  %s1882_s5 = int_to_ptr.vmem [resolvable:$true] %s332_s5 }
  0x41   : > { %s1891_s14 = scalar_lea.sflag [#allocation4], %s321_s26 }
  0x42   : > { %p1539_p0 = pneg %p1886_p9 }
  0x45   : > { %s1880_s2 = scalar_lea.hbm %s2167_s0, %s1208_s27  ;;  %s1542_s25 = scalar_lea.hbm %s2167_s0, 1024 }
  0x46   : > { %s1537_s23 = scalar_lea.hbm %s1880_s2, 256  ;;  %p1543_p13 = scmp.lt.s32.totalorder %s1880_s2, %s2167_s0 }
  0x47   : > { %p1538_p12 = scmp.ne.s32.totalorder %s1880_s2, %s1537_s23  ;;  %p1544_p1 = scmp.lt.s32.totalorder %s1542_s25, %s1537_s23 }
  0x49   : > { %p1540_p2 = pnand %p1539_p0, %p1538_p12  ;;  %p1545_p7 = por %p1544_p1, %p1543_p13 }
  0x4b   : > { %p1541_p10 = pneg %p1540_p2 }
  0x4d   : > { %p1546_p5 = pnand %p1545_p7, %p1541_p10 }
  0x4f   : > { %1549 = shalt.err (!%p1546_p5)
}
  0x50   : > { %s1550_s26 = scalar_lea.vmem %s1882_s5, 256  ;;  %s1699_s22 = smov [#allocation3]  }
  0x51   : > { %p1551_p8 = scmp.ne.s32.totalorder %s1882_s5, %s1550_s26  ;;  %s1555_s20 = sshll.u32 %s1699_s22, 4  ;;  %s1556_s20 = int_to_ptr.vmem [resolvable:$false] %s1555_s20 }
  0x52   : > { %s1557_s28 = scalar_lea.vmem %s1556_s20, 512  ;;  %p1558_p2 = scmp.lt.s32.totalorder %s1882_s5, %s1556_s20 }
  0x53   : > { %p1553_p3 = pnand %p1551_p8, %p1539_p0  ;;  %p1559_p6 = scmp.lt.s32.totalorder %s1557_s28, %s1550_s26 }
  0x55   : > { %p1554_p12 = pneg %p1553_p3  ;;  %p1560_p4 = por %p1559_p6, %p1558_p2 }
  0x57   : > { %p1561_p11 = pnand %p1560_p4, %p1554_p12 }
  0x59   : > { %1564 = shalt.err (!%p1561_p11)
}
  0x5a   : > { %s2169_s23 = smov 4   ;;  %s2170_s29 = smov 64  }
  0x5b   : > { %1369 = dma.hbm_to_vmem [thread:$0]  (!%p1886_p9), %s1880_s2, 256, %s1882_s5, %s1891_s14, %s2170_s29, %s2170_s29, %s2169_s23  }
  0x5c   : > { %s2171_s20 = sshll.u32 %s1693_s15, 1  ;;  %s70_s30 = sadd.s32 1, %s1677_s11 }
  0x5d   : > { %s1137_s22 = sadd.s32 4294967295, %s2171_s20  ;;  %s2172_s25 = smov %s2171_s20 }
  0x5e   : > { %s1207_s24 = sadd.s32 2, %s2172_s25  ;;  %p61_p1 = scmp.gt.s32.totalorder %s1137_s22, 0 }
  0x5f   : > { %s1139_s27 = sadd.s32 4294967295, %s1207_s24  ;;  %p77_p6 = scmp.ne.s32.totalorder %s1677_s11, %s1673_s10 }
  0x60   : > { %p65_p4 = scmp.gt.s32.totalorder %s1139_s27, 0  ;;  %s2199_s22 = smov (!%p61_p1, %s1137_s22), 0 }
  0x61   : > { %s342_s26 = sand.u32 1, %s1693_s15   ;;  %p2173_p11 = scmp.eq.s32.totalorder %s1693_s15, 0 }
  0x62   : > { %s2201_s27 = smov (!%p65_p4, %s1139_s27), 0  ;;  %s344_s0 = sand.u32 1, %s1677_s11  }
  0x63   : > { %s67_s28 = ssub.s32 %s2199_s22, %s2201_s27  ;;  %p79_p5 = por %p77_p6, %p2173_p11 }
  0x64   : > { %p68_p8 = scmp.eq.s32.totalorder %s67_s28, 0  ;;  %s1209_s2 = sshll.u32 %s2199_s22, 7 }
  0x65   : > { %s1147_s14 = sshll.u32 %s344_s0, 3  ;;  %s1932_s12 = scalar_lea.hbm %s2125_s1, %s1209_s2 }
  0x66   : > { %s1927_s5 = scalar_select %p68_p8, %s1677_s11, %s70_s30  }
  0x67   : > { %p2175_p3 = scmp.lt.s32.totalorder %s1693_s15, 4  ;;  %s346_s27 = scalar_lea.vmem [#allocation6], %s1147_s14 }
  0x68   : > { %2174 = sst [smem:[#allocation22_spill]] %s1927_s5  ;;  %s357_s28 = sshll.u32 %s346_s27, 4  ;;  %s1940_s28 = int_to_ptr.vmem [resolvable:$true] %s357_s28 }
  0x69   : > { %p1936_p7 = pnand %p2175_p3, %p79_p5  ;;  %s1942_s22 = scalar_lea.sflag [#allocation7], %s342_s26 }
  0x6a   : > { %s1565_s0 = scalar_lea.hbm %s1932_s12, 128  ;;  %s1570_s20 = scalar_lea.hbm %s2125_s1, 1024 }
  0x6b   : > { %p1566_p9 = scmp.ne.s32.totalorder %s1932_s12, %s1565_s0  ;;  %p1567_p0 = pneg %p1936_p7 }
  0x6c   : > { %p1571_p12 = scmp.lt.s32.totalorder %s1932_s12, %s2125_s1  ;;  %p1572_p2 = scmp.lt.s32.totalorder %s1570_s20, %s1565_s0 }
  0x6d   : > { %p1568_p10 = pnand %p1567_p0, %p1566_p9 }
  0x6e   : > { %p1573_p1 = por %p1572_p2, %p1571_p12 }
  0x6f   : > { %p1569_p13 = pneg %p1568_p10 }
  0x71   : > { %p1574_p4 = pnand %p1573_p1, %p1569_p13 }
  0x73   : > { %1577 = shalt.err (!%p1574_p4)
}
  0x74   : > { %s1578_s26 = scalar_lea.vmem %s1940_s28, 128  ;;  %s1700_s14 = smov [#allocation6]  }
  0x75   : > { %p1579_p6 = scmp.ne.s32.totalorder %s1940_s28, %s1578_s26  ;;  %s1583_s27 = sshll.u32 %s1700_s14, 4  ;;  %s1584_s27 = int_to_ptr.vmem [resolvable:$false] %s1583_s27 }
  0x76   : > { %s1585_s30 = scalar_lea.vmem %s1584_s27, 256  ;;  %p1586_p5 = scmp.lt.s32.totalorder %s1940_s28, %s1584_s27 }
  0x77   : > { %p1581_p8 = pnand %p1579_p6, %p1567_p0  ;;  %p1587_p3 = scmp.lt.s32.totalorder %s1585_s30, %s1578_s26 }
  0x79   : > { %p1582_p11 = pneg %p1581_p8  ;;  %p1588_p9 = por %p1587_p3, %p1586_p5 }
  0x7b   : > { %p1589_p10 = pnand %p1588_p9, %p1582_p11 }
  0x7d   : > { %1592 = shalt.err (!%p1589_p10)
}
  0x7e   : > { %1372 = dma.hbm_to_vmem [thread:$0]  (!%p1936_p7), %s1932_s12, 128, %s1940_s28, %s1942_s22, %s2170_s29, %s2170_s29, %s2169_s23  }
  0x7f   : > { %p2177_p0 = scmp.ne.s32.totalorder %s2159_s21, 0 }
  0x80   : > { %s1969_s5 = sand.u32 (!%p2177_p0), 1, %s1685_s13   ;;  %p2178_p13 = scmp.ne.s32.totalorder (!%p2177_p0), %s2155_s18, 0 }
  0x81   : > { %369 = sbr.rel (%p2177_p0) target bundleno = 1049 (0x419), region = 56  ;;  %s1153_s0 = sshll.u32 (!%p2177_p0), %s1969_s5, 4 }
  0x82   : > { %s372_s2 = scalar_lea.sflag (!%p2177_p0), [#allocation4], %s1969_s5  ;;  %s1975_s24 = scalar_lea.vmem (!%p2177_p0), [#allocation3], %s1153_s0 }
  0x86   : > { %1648 = dma.done.wait (%p2178_p13), %s372_s2, 256  }
  0x87   : > { %1650 = vsyncadd (%p2178_p13), %s372_s2, 4294967040  ;;  %s380_s12 = sand.u32 1, %s1791_s16   ;;  %s382_s21 = sand.u32 1, %s1673_s10  }
  0x88   : > { %s1983_s23 = sshll.u32 %s382_s21, 3  ;;  %s381_s29 = scalar_lea.sflag [#allocation7], %s380_s12 }
  0x89   : > { %s384_s28 = scalar_lea.vmem [#allocation6], %s1983_s23  ;;  %p2179_p7 = scmp.ne.s32.totalorder %s2156_s19, 0 }
  0x8b   : > { %1652 = dma.done.wait (%p2179_p7), %s381_s29, 128  }
  0x8c   : > { %1654 = vsyncadd (%p2179_p7), %s381_s29, 4294967168  ;;  %p2180_p12 = scmp.eq.s32.totalorder %s1791_s16, 0 }
  0x8e   : > { %1656 = dma.done.wait (%p2180_p12), [#allocation7], 1024   ;;  %p2181_p2 = pmov %p2180_p12 }
  0x90   : > { %1658 = vsyncadd (%p2181_p2), [#allocation7], 4294966272  ;;  %p2182_p1 = pmov %p2181_p2 }
  0x92   : > { %1660 = dma.done.wait (%p2182_p1), [#allocation10], 1024   ;;  %p2183_p4 = pmov %p2182_p1 }
  0x93   : > { %v2001_v0 = vld [vmem:[%s2128_s4] sm:$0x7]  ;;  %v1449_v2 = vld [vmem:[#allocation8 + $0x30] sm:$0xff]   ;;  %v1450_v3 = vld [vmem:[#allocation8 + $0x28] sm:$0xff]   ;;  %s2024_s25 = scalar_lea.vmem [#allocation11], %s1153_s0  ;;  %p2184_p6 = scmp.ne.s32.totalorder %s1791_s16, 0 }
  0x94   : > { %1662 = vsyncadd (%p2183_p4), [#allocation10], 4294966272  ;;  %v1448_v1 = vld [vmem:[#allocation8 + $0x38] sm:$0xff]   ;;  %v2004_v4 = vld [vmem:[%s1975_s24] sm:$0xff]  }
  0x95   : > { %1285 = vmatprep.subr.bf16.mxu0 %v1448_v1  ;;  %v1451_v5 = vld [vmem:[#allocation8 + $0x20] sm:$0xff]   ;;  %1301 = vmatprep.mubr.bf16.mxu0 %v2004_v4  ;;  %v1452_v6 = vld [vmem:[#allocation8 + $0x18] sm:$0xff]   ;;  %v1453_v7 = vld [vmem:[#allocation8 + $0x10] sm:$0xff]  }
  0x96   : > { %1286 = vmatpush3.bf16.msra.mxu0 %v1448_v1  ;;  %v1454_v8 = vld [vmem:[#allocation8 + $0x8] sm:$0xff]   ;;  %v1455_v9 = vld [vmem:[#allocation8] sm:$0xff]   ;;  %v1158_v11 = vld [vmem:[%s2127_s3] ss:$0 sm:$0xff] }
  0x97   : > { %1287 = vmatprep.subr.bf16.mxu0 %v1449_v2  ;;  %v2008_v10 = vld [vmem:[%s1975_s24 + $0x8] sm:$0xff]  }
  0x9a   : > { %1288 = vmatpush3.bf16.msra.mxu0 %v1449_v2 }
  0x9b   : > { %1289 = vmatprep.subr.bf16.mxu0 %v1450_v3 }
  0x9e   : > { %1290 = vmatpush3.bf16.msra.mxu0 %v1450_v3 }
  0x9f   : > { %1291 = vmatprep.subr.bf16.mxu0 %v1451_v5 }
  0xa2   : > { %1292 = vmatpush3.bf16.msra.mxu0 %v1451_v5 }
  0xa3   : > { %1293 = vmatprep.subr.bf16.mxu0 %v1452_v6 }
  0xa6   : > { %1294 = vmatpush3.bf16.msra.mxu0 %v1452_v6 }
  0xa7   : > { %1295 = vmatprep.subr.bf16.mxu0 %v1453_v7 }
  0xaa   : > { %1296 = vmatpush3.bf16.msra.mxu0 %v1453_v7 }
  0xab   : > { %1297 = vmatprep.subr.bf16.mxu0 %v1454_v8 }
  0xae   : > { %1298 = vmatpush3.bf16.msra.mxu0 %v1454_v8 }
  0xaf   : > { %1299 = vmatprep.subr.bf16.mxu0 %v1455_v9 }
  0xb2   : > { %1300 = vmatpush3.bf16.msra.mxu0 %v1455_v9 }
  0xb5   : > { %1302 = vmatmul.mubr.bf16.vlgmr.msra.gmra.mxu0 %v2008_v10 }
 0x175   : > { %v1303_v12 = vpop.f32.mrf.mxu0 }
 0x176   : > { %v2014_v13 = vadd.f32 %v1303_v12, %v1158_v11 }
 0x177   : > { %v561_v14 = vpop.f32.mrf.mxu0 }
 0x178   : > { %v2016_v15 = vadd.f32 %v1158_v11, %v561_v14  ;;  %580 = sbr.rel (%p2184_p6) target bundleno = 383 (0x17f), region = 76 }
 0x179   : > { %v1304_v16 = vpop.f32.mrf.mxu0 }
 0x17a   : > { %v2018_v17 = vadd.f32 %v1304_v16, %v1158_v11 }
 0x17b   : > { %v564_v18 = vpop.f32.mrf.mxu0 }
 0x17c   : > { %v2020_v19 = vadd.f32 %v1158_v11, %v564_v18 }
 0x17d   : > { %v1701_v20 = vmov 0  }
 0x17e   : > { %581 = vst [vmem:[#allocation2] sm:$0xf] %v1701_v20  ;;  %582 = vst [vmem:[#allocation2 + $0x4] sm:$0xf] %v1701_v20 }
 0x17f PF: > { %p1170_p8 = scmp.le.s32.totalorder %s1791_s16, 0 }
 0x181   : > { %586 = sbr.rel (%p1170_p8) target bundleno = 625 (0x271), region = 80 }
 0x186   : > { %v1460_v21 = vld [vmem:[#allocation8 + $0x38] sm:$0xff]   ;;  %v1702_v22 = vmov 0.0   ;;  %v1461_v23 = vld [vmem:[#allocation8 + $0x30] sm:$0xff]   ;;  %vm1703_vm0 = vmmov 0   ;;  %v1462_v24 = vld [vmem:[#allocation8 + $0x28] sm:$0xff]  }
 0x187   : > { %1305 = vmatprep.subr.bf16.mxu0 %v1702_v22  ;;  %1321 = vmatprep.mubr.msk.bf16.mxu0 %vm1703_vm0, %v1702_v22  ;;  %v1463_v25 = vld [vmem:[#allocation8 + $0x20] sm:$0xff]   ;;  %v1464_v26 = vld [vmem:[#allocation8 + $0x18] sm:$0xff]   ;;  %v1465_v27 = vld [vmem:[#allocation8 + $0x10] sm:$0xff]  }
 0x188   : > { %1306 = vmatpush3.bf16.msra.mxu0 %v1460_v21  ;;  %v1466_v28 = vld [vmem:[#allocation8 + $0x8] sm:$0xff]   ;;  %v1467_v29 = vld [vmem:[#allocation8] sm:$0xff]   ;;  %v1468_v30 = vld [vmem:[%s384_s28] sm:$0xff]  }
 0x189   : > { %1307 = vmatprep.subr.bf16.mxu0 %v1702_v22  ;;  %v1171_v32 = vld [vmem:[%s2127_s3] ss:$0 sm:$0xff] }
 0x18c   : > { %1308 = vmatpush3.bf16.msra.mxu0 %v1461_v23 }
 0x18d   : > { %1309 = vmatprep.subr.bf16.mxu0 %v1702_v22 }
 0x190   : > { %1310 = vmatpush3.bf16.msra.mxu0 %v1462_v24 }
 0x191   : > { %1311 = vmatprep.subr.bf16.mxu0 %v1702_v22 }
 0x194   : > { %1312 = vmatpush3.bf16.msra.mxu0 %v1463_v25 }
 0x195   : > { %1313 = vmatprep.subr.bf16.mxu0 %v1702_v22 }
 0x198   : > { %1314 = vmatpush3.bf16.msra.mxu0 %v1464_v26 }
 0x199   : > { %1315 = vmatprep.subr.bf16.mxu0 %v1702_v22 }
 0x19c   : > { %1316 = vmatpush3.bf16.msra.mxu0 %v1465_v27 }
 0x19d   : > { %1317 = vmatprep.subr.bf16.mxu0 %v1702_v22 }
 0x1a0   : > { %1318 = vmatpush3.bf16.msra.mxu0 %v1466_v28 }
 0x1a1   : > { %1319 = vmatprep.subr.bf16.mxu0 %v1702_v22 }
 0x1a4   : > { %1320 = vmatpush3.bf16.msra.mxu0 %v1467_v29 }
 0x1a7   : > { %1322 = vmatmul.mubr.bf16.vlgmr.msra.gmra.mxu0 %v1468_v30 }
 0x267   : > { %v700_v31 = vpop.f32.mrf.mxu0 }
 0x268   : > { %v701_v35 = vadd.f32 %v1171_v32, %v700_v31 }
 0x269   : > { %v1323_v33 = vpop.f32.mrf.mxu0 }
 0x26b   : > { %v703_v34 = vpop.f32.mrf.mxu0 }
 0x26c   : > { %v704_v36 = vadd.f32 %v1171_v32, %v703_v34 }
 0x26d   : > { %v1324_v37 = vpop.f32.mrf.mxu0 }
 0x26e   : > { %v1223_v38 = vpack.c.bf16 %v704_v36, %v701_v35 }
 0x270   : > { %1224 = vst [vmem:[#allocation2] sm:$0xff] %v1223_v38  }
 0x271 PF: > { %v1469_v39 = vld [vmem:[#allocation9 + $0x38] sm:$0xff]   ;;  %v1228_v40 = vpack.c.bf16 %v2020_v19, %v2016_v15  ;;  %v733_v41 = vlaneseq  ;;  %v1214_v42 = vpack.c.bf16 %v2014_v13, %v2014_v13  ;;  %v1470_v43 = vld [vmem:[#allocation9 + $0x30] sm:$0xff]   ;;  %v1471_v45 = vld [vmem:[#allocation9 + $0x28] sm:$0xff]   ;;  %v905_v27 = vunpack.c.l.bf16 %v2008_v10  ;;  %s1219_s21 = sshll.u32 %s1791_s16, 8  ;;  %s1020_s23 = sshll.u32 %s2024_s25, 4  ;;  %s2071_s23 = int_to_ptr.vmem [resolvable:$true] %s1020_s23 }
 0x272   : > { %1325 = vmatprep.subr.bf16.mxu0 %v1469_v39  ;;  %v1472_v52 = vld [vmem:[#allocation9 + $0x20] sm:$0xff]   ;;  %v1473_v2 = vld [vmem:[#allocation9 + $0x18] sm:$0xff]   ;;  %v903_v30 = vunpack.c.l.bf16 %v2004_v4  ;;  %v906_v34 = vunpack.c.h.bf16 %v2008_v10  ;;  %v904_v38 = vunpack.c.h.bf16 %v2004_v4  ;;  %s2069_s18 = scalar_lea.hbm %s2133_s9, %s1219_s21  ;;  %s1007_s22 = scalar_lea.sflag [#allocation5], %s1969_s5 }
 0x273   : > { %v734_v44 = vshrl.u32 %v733_v41, 7  ;;  %732 = vst [vmem:[#allocation2 + $0x10] sm:$0xf] %v1214_v42  ;;  %1326 = vmatpush3.bf16.msra.mxu0 %v1469_v39  ;;  %v1240_v51 = vunpack.c.l.bf16 %v1228_v40  ;;  %v1241_v6 = vunpack.c.h.bf16 %v1228_v40  ;;  %v1476_v24 = vld [vmem:[#allocation9] sm:$0xff]   ;;  %s1593_s19 = scalar_lea.vmem %s2071_s23, 256  ;;  %p2185_p5 = scmp.ne.s32.totalorder %s2165_s17, 0 }
 0x274   : > { %1327 = vmatprep.subr.bf16.mxu0 %v1470_v43  ;;  %p1594_p11 = scmp.ne.s32.totalorder %s2071_s23, %s1593_s19  ;;  %s1704_s16 = smov [#allocation11]  }
 0x275   : > { %v735_v46 = vsub.s32 2, %v734_v44  ;;  %v751_v47 = vsub.s32 0, %v734_v44  ;;  %v771_v49 = vsub.s32 1, %v734_v44  ;;  %s1597_s20 = sshll.u32 %s1704_s16, 4  ;;  %s1598_s20 = int_to_ptr.vmem [resolvable:$false] %s1597_s20 }
 0x276   : > { %p1595_p3 = pnand %p1594_p11, %p2185_p5  ;;  %s1599_s26 = scalar_lea.vmem %s1598_s20, 512 }
 0x277   : > { %v736_v48 = vrot.slane %v2001_v0, %v735_v46  ;;  %1328 = vmatpush3.bf16.msra.mxu0 %v1470_v43  ;;  %v752_v50 = vrot.slane %v2001_v0, %v751_v47  ;;  %v1231_v54 = vld [vmem:[#allocation2] sm:$0xff]   ;;  %v772_v56 = vrot.slane %v2001_v0, %v771_v49  ;;  %v1474_v0 = vld [vmem:[#allocation9 + $0x10] sm:$0xff]   ;;  %p1600_p10 = scmp.lt.s32.totalorder %s2071_s23, %s1598_s20  ;;  %p1601_p0 = scmp.lt.s32.totalorder %s1599_s26, %s1593_s19 }
 0x278   : > { %1329 = vmatprep.subr.bf16.mxu0 %v1471_v45  ;;  %v761_v55 = vld [vmem:[#allocation2 + $0x4] sm:$0xf]  ;;  %v1232_v58 = vunpack.c.l.bf16 %v1231_v54  ;;  %v1233_v59 = vunpack.c.h.bf16 %v1231_v54  ;;  %p1596_p9 = pneg %p1595_p3 }
 0x279   : > { %v737_v53 = vmul.f32 %v736_v48, %v2016_v15  ;;  %v738_v57 = vmul.f32 %v736_v48, %v2020_v19  ;;  %v765_v60 = vunpack.c.l.bf16 %v761_v55  ;;  %v774_v1 = vmul.f32 %v1240_v51, %v772_v56  ;;  %v1475_v19 = vld [vmem:[#allocation9 + $0x8] sm:$0xff]   ;;  %p1602_p13 = por %p1601_p0, %p1600_p10 }
 0x27a   : > { %v753_v61 = vmul.f32 %v1232_v58, %v752_v50  ;;  %v754_v62 = vmul.f32 %v1233_v59, %v752_v50  ;;  %v764_v9 = vld [vmem:[#allocation2 + $0x10] sm:$0xf]  ;;  %v739_v12 = vmul.f32 %v736_v48, %v2014_v13  ;;  %v740_v14 = vmul.f32 %v736_v48, %v2018_v17  ;;  %v1186_v17 = vld [vmem:[%s2130_s6] ss:$0 sm:$0xff] }
 0x27b   : > { %1330 = vmatpush3.bf16.msra.mxu0 %v1471_v45  ;;  %v773_v63 = vmul.f32 %v772_v56, %v765_v60  ;;  %v755_v15 = vmul.f32 %v1240_v51, %v752_v50  ;;  %v756_v16 = vmul.f32 %v1241_v6, %v752_v50  ;;  %v768_v18 = vunpack.c.l.bf16 %v764_v9  ;;  %p1603_p7 = pnand %p1602_p13, %p1596_p9 }
 0x27c   : > { %1331 = vmatprep.subr.bf16.mxu0 %v1472_v52  ;;  %v757_v3 = vadd.f32 %v753_v61, %v737_v53  ;;  %v758_v5 = vadd.f32 %v754_v62, %v738_v57  ;;  %v775_v22 = vmul.f32 %v1241_v6, %v772_v56 }
 0x27d   : > { %v759_v20 = vadd.f32 %v755_v15, %v739_v12  ;;  %v760_v21 = vadd.f32 %v756_v16, %v740_v14  ;;  %v776_v23 = vmul.f32 %v772_v56, %v768_v18  ;;  %v1195_v15 = vld [vmem:[%s2131_s7] ss:$0 sm:$0xff] }
 0x27e   : > { %v777_v7 = vadd.f32 %v773_v63, %v757_v3  ;;  %v778_v8 = vadd.f32 %v774_v1, %v758_v5 }
 0x27f   : > { %1332 = vmatpush3.bf16.msra.mxu0 %v1472_v52  ;;  %v779_v25 = vadd.f32 %v775_v22, %v759_v20  ;;  %v780_v26 = vadd.f32 %v776_v23, %v760_v21 }
 0x280   : > { %1333 = vmatprep.subr.bf16.mxu0 %v1473_v2  ;;  %v781_v11 = vpack.c.bf16 %v778_v8, %v777_v7 }
 0x281   : > { %v782_v13 = vpack.c.bf16 %v780_v26, %v779_v25  ;;  %v1196_v25 = vld [vmem:[%s2132_s8] ss:$0 sm:$0xff] }
 0x282   : > { %1341 = vmatprep.mubr.bf16.mxu0 %v781_v11 }
 0x283   : > { %1334 = vmatpush3.bf16.msra.mxu0 %v1473_v2 }
 0x284   : > { %1335 = vmatprep.subr.bf16.mxu0 %v1474_v0 }
 0x287   : > { %1336 = vmatpush3.bf16.msra.mxu0 %v1474_v0 }
 0x288   : > { %1337 = vmatprep.subr.bf16.mxu0 %v1475_v19 }
 0x28b   : > { %1338 = vmatpush3.bf16.msra.mxu0 %v1475_v19 }
 0x28c   : > { %1339 = vmatprep.subr.bf16.mxu0 %v1476_v24 }
 0x28f   : > { %1340 = vmatpush3.bf16.msra.mxu0 %v1476_v24 }
 0x292   : > { %1342 = vmatmul.mubr.bf16.vlgmr.msra.gmra.mxu0 %v782_v13 }
 0x352   : > { %v1343_v28 = vpop.f32.mrf.mxu0 }
 0x353   : > { %v897_v29 = vadd.f32 %v1343_v28, %v1186_v17 }
 0x354   : > { %v888_v31 = vpop.f32.mrf.mxu0 }
 0x355   : > { %v2050_v32 = vadd.f32 %v905_v27, %v897_v29  ;;  %v889_v33 = vadd.f32 %v1186_v17, %v888_v31 }
 0x356   : > { %v1344_v35 = vpop.f32.mrf.mxu0 }
 0x357   : > { %v907_v36 = vadd.f32 %v903_v30, %v889_v33  ;;  %v900_v37 = vadd.f32 %v1344_v35, %v1186_v17  ;;  %915 = vadd.xlane.f32.xlu1 %v2050_v32  ;;  %v926_v10 = vmul.f32 %v2050_v32, %v2050_v32 }
 0x358   : > { %v891_v39 = vpop.f32.mrf.mxu0 }
 0x359   : > { %v910_v40 = vadd.f32 %v906_v34, %v900_v37  ;;  %v892_v41 = vadd.f32 %v1186_v17, %v891_v39  ;;  %911 = vadd.xlane.f32.xlu0 %v907_v36  ;;  %v924_v43 = vmul.f32 %v907_v36, %v907_v36 }
 0x35b   : > { %v908_v42 = vadd.f32 %v904_v38, %v892_v41  ;;  %917 = vadd.xlane.f32.xlu1 %v910_v40  ;;  %v927_v45 = vmul.f32 %v910_v40, %v910_v40 }
 0x35d   : > { %928 = vadd.xlane.f32.xlu0 %v924_v43  ;;  %v925_v44 = vmul.f32 %v908_v42, %v908_v42 }
 0x35f   : > { %930 = vadd.xlane.f32.xlu1 %v925_v44 }
 0x361   : > { %913 = vadd.xlane.f32.xlu0 %v908_v42 }
 0x363   : > { %934 = vadd.xlane.f32.xlu1 %v927_v45 }
 0x365   : > { %932 = vadd.xlane.f32.xlu0 %v926_v10 }
 0x3e0   : > { %v916_v46 = vpop.xlane.xlu1 %915 }
 0x3e1   : > { %v922_v56 = vmul.f32 0.0078125, %v916_v46 }
 0x3e2   : > { %v912_v47 = vpop.xlane.xlu0 %911 }
 0x3e3   : > { %v920_v4 = vmul.f32 0.0078125, %v912_v47  ;;  %v946_v2 = vmul.f32 %v922_v56, %v922_v56  ;;  %v942_v21 = vsub.f32 %v2050_v32, %v922_v56 }
 0x3e4   : > { %v918_v48 = vpop.xlane.xlu1 %917 }
 0x3e5   : > { %v944_v50 = vmul.f32 %v920_v4, %v920_v4  ;;  %v923_v52 = vmul.f32 0.0078125, %v918_v48  ;;  %v940_v12 = vsub.f32 %v907_v36, %v920_v4 }
 0x3e6   : > { %v929_v49 = vpop.xlane.xlu0 %928 }
 0x3e7   : > { %v936_v51 = vmul.f32 0.0078125, %v929_v49  ;;  %v947_v59 = vmul.f32 %v923_v52, %v923_v52  ;;  %v943_v19 = vsub.f32 %v910_v40, %v923_v52 }
 0x3e8   : > { %v931_v53 = vpop.xlane.xlu1 %930 }
 0x3e9   : > { %v948_v54 = vsub.f32 %v936_v51, %v944_v50  ;;  %v937_v61 = vmul.f32 0.0078125, %v931_v53 }
 0x3ea   : > { %v914_v55 = vpop.xlane.xlu0 %913 }
 0x3eb   : > { %v952_v57 = vadd.f32 1e-05, %v948_v54  ;;  %v921_v58 = vmul.f32 0.0078125, %v914_v55 }
 0x3ec   : > { %v935_v60 = vpop.xlane.xlu1 %934 }
 0x3ed   : > { %1477 = vrsqrt.f32 %v952_v57  ;;  %v945_v62 = vmul.f32 %v921_v58, %v921_v58  ;;  %v939_v63 = vmul.f32 0.0078125, %v935_v60  ;;  %v941_v16 = vsub.f32 %v908_v42, %v921_v58 }
 0x3ee   : > { %v933_v1 = vpop.xlane.xlu0 %932 }
 0x3ef   : > { %v949_v3 = vsub.f32 %v937_v61, %v945_v62  ;;  %v951_v5 = vsub.f32 %v939_v63, %v947_v59  ;;  %v938_v6 = vmul.f32 0.0078125, %v933_v1 }
 0x3f1   : > { %v953_v7 = vadd.f32 1e-05, %v949_v3  ;;  %v955_v8 = vadd.f32 1e-05, %v951_v5  ;;  %v950_v9 = vsub.f32 %v938_v6, %v946_v2 }
 0x3f3   : > { %1479 = vrsqrt.f32 %v953_v7  ;;  %v954_v0 = vadd.f32 1e-05, %v950_v9 }
 0x3f4   : > { %1481 = vrsqrt.f32 %v955_v8 }
 0x3f5   : > { %1483 = vrsqrt.f32 %v954_v0 }
 0x3fa   : > { %v1478_v11 = vpop.eup %1477 }
 0x3fb   : > { %v960_v14 = vmul.f32 %v1478_v11, %v940_v12 }
 0x3fd   : > { %v971_v22 = vmul.f32 %v1195_v15, %v960_v14 }
 0x3ff   : > { %v982_v28 = vadd.f32 %v1196_v25, %v971_v22 }
 0x400   : > { %v1480_v18 = vpop.eup %1479 }
 0x401   : > { %v1482_v20 = vpop.eup %1481  ;;  %v961_v23 = vmul.f32 %v1480_v18, %v941_v16 }
 0x402   : > { %v1484_v24 = vpop.eup %1483  ;;  %v963_v26 = vmul.f32 %v1482_v20, %v943_v19 }
 0x403   : > { %v972_v13 = vmul.f32 %v1195_v15, %v961_v23  ;;  %v962_v17 = vmul.f32 %v1484_v24, %v942_v21 }
 0x404   : > { %v974_v27 = vmul.f32 %v1195_v15, %v963_v26 }
 0x405   : > { %v983_v29 = vadd.f32 %v1196_v25, %v972_v13  ;;  %v973_v30 = vmul.f32 %v1195_v15, %v962_v17 }
 0x406   : > { %v985_v33 = vadd.f32 %v1196_v25, %v974_v27 }
 0x407   : > { %v1245_v31 = vpack.c.bf16 %v983_v29, %v982_v28  ;;  %v984_v32 = vadd.f32 %v1196_v25, %v973_v30 }
 0x409   : > { %1246 = vst [vmem:[%s2024_s25] sm:$0xff] %v1245_v31   ;;  %v1250_v34 = vpack.c.bf16 %v985_v33, %v984_v32 }
 0x40b   : > { %1255 = vst [vmem:[%s2024_s25 + $0x8] sm:$0xff] %v1250_v34  }
 0x40c   : > { %1606 = shalt.err (!%p1603_p7)
}
 0x40d   : > { %s1607_s25 = scalar_lea.hbm %s2069_s18, 256  ;;  %s1611_s30 = scalar_lea.hbm %s2133_s9, 1024 }
 0x40e   : > { %p1608_p12 = scmp.ne.s32.totalorder %s2069_s18, %s1607_s25  ;;  %p1612_p4 = scmp.lt.s32.totalorder %s2069_s18, %s2133_s9 }
 0x40f   : > { %p1613_p6 = scmp.lt.s32.totalorder %s1611_s30, %s1607_s25 }
 0x410   : > { %p1609_p2 = pnand %p1608_p12, %p2185_p5 }
 0x411   : > { %p1614_p8 = por %p1613_p6, %p1612_p4 }
 0x412   : > { %p1610_p1 = pneg %p1609_p2 }
 0x414   : > { %p1615_p11 = pnand %p1614_p8, %p1610_p1 }
 0x416   : > { %1618 = shalt.err (!%p1615_p11)
}
 0x417   : > { %s1705_s24 = smov 64   ;;  %s1706_s12 = smov 4  }
 0x418   : > { %1357 = dma.vmem_to_hbm [thread:$0]  (%p2185_p5), %s2071_s23, 256, %s2069_s18, %s1007_s22, %s1705_s24, %s1705_s24, %s1706_s12  }
 0x419 PF: > { %s2186_s21 = sld [smem:[#allocation17_spill]]  ;;  %p1382_p3 = scmp.ge.s32.totalorder %s1693_s15, 2 }
 0x41a   : > { %s2187_s29 = sld [smem:[#allocation19_spill]] }
 0x41f   : > { %s1035_s28 = sand.u32 1, %s2186_s21  }
 0x420   : > { %p2188_p9 = scmp.ne.s32.totalorder %s2187_s29, 0  ;;  %s1036_s19 = scalar_lea.sflag [#allocation5], %s1035_s28 }
 0x422   : > { %p1374_p10 = pnand %p1382_p3, %p2188_p9 }
 0x424   : > { %p1375_p0 = pneg %p1374_p10 }
 0x426   : > { %1664 = dma.done.wait (%p1375_p0), %s1036_s19, 256  }
 0x427   : > { %1666 = vsyncadd (%p1375_p0), %s1036_s19, 4294967040  ;;  %s2189_s15 = sld [smem:[#allocation20_spill]]  ;;  %s2193_s30 = smov %s1673_s10 }
 0x428   : > { %s2190_s16 = sld [smem:[#allocation22_spill]]  ;;  %s2194_s10 = smov %s1677_s11 }
 0x429   : > { %s2191_s17 = sld [smem:[#allocation18_spill]]  ;;  %s2196_s12 = smov %s1685_s13 }
 0x42a   : > { %s2192_s14 = sld [smem:[#allocation21_spill]] }
 0x42d   : > { %p26_p5 = scmp.ge.s32.totalorder %s2189_s15, 6  }
 0x42e   : > { %s2195_s11 = smov %s2190_s16 }
 0x42f   : > { %s2197_s13 = smov %s2191_s17  ;;  %28 = sbr.rel (!%p26_p5) target bundleno = 14 (0xe), region = 130 }
 0x434   :  { %1041 = vsyncpa [#allocation4], 1 }
 0x435   :  { %1043 = vsyncpa [#allocation4 + $0x1], 1 }
 0x436   :  { %1044 = vsyncpa [#allocation7], 1 }
 0x437   :  { %1046 = vsyncpa [#allocation7 + $0x1], 1 }
 0x438   :  { %1047 = vsyncpa [#allocation10], 1 }
 0x439   :  { %1048 = vsyncpa [#allocation5], 1 }
 0x43a   :  { %1050 = vsyncpa [#allocation5 + $0x1], 1 }

</bundles_post_ra>
